<compile_context>
chip_gen: v5e
topology: v5e:2x2
jax: 0.10.0
libtpu: 0.0.40
codegen_flags: <defaults>
</compile_context>

<pallas_src>
import functools

import jax
import jax.numpy as jnp
from jax import lax
from jax.experimental import pallas as pl
from jax.experimental.pallas import tpu as pltpu

_LANE = 128


# ----------------------------------------------------------------------------
# Small integer helpers (trace-time only).
# ----------------------------------------------------------------------------
def _ceil_div(a, b):
    return -(-a // b)


def _round_down(x, m):
    return (x // m) * m


def _round_up(x, m):
    return _ceil_div(x, m) * m


def _vmem_budget_and_limit():
    """Generation-aware VMEM sizing.

    v5e/v6e have 128 MiB physical VMEM per core -> large tile budget; v7x has
    only 64 MiB -> stay conservative.  Always leave headroom below physical.
    """
    cap = None
    try:
        cap = int(pltpu.get_tpu_info().vmem_capacity_bytes)
    except Exception:
        cap = None
    if cap is not None and cap >= 100 * 1024 * 1024:       # v5e / v6e class
        budget, limit = 48 * 1024 * 1024, 96 * 1024 * 1024
    else:                                                   # v7x / unknown
        budget, limit = 16 * 1024 * 1024, 32 * 1024 * 1024
    if cap is not None:
        limit = min(limit, (3 * cap) // 4)
        budget = min(budget, limit // 2)
    return budget, limit


def _choose_tiling(B, D, itemsize, vmem_budget):
    """Pick (tb, td) stage-1 tile sizes.

    VMEM per tile element: 2 inputs x 2 pipeline buffers of the input dtype
    plus ~8 bytes of f32 temporaries (upcast diff + square).  The (1, tb) f32
    output block and the small ones-row constant ride in the budget/limit gap.
    """
    per_elem = 4 * itemsize + 8
    # 128-row tiles keep the lane-dense (1, tb) output block unmasked and are a
    # multiple of every dtype's packed sublane count (8 f32 / 16 bf16 / 32 i8).
    min_tb = min(B, _LANE)

    if min_tb * D * per_elem > vmem_budget:
        # Feature axis too wide even for a minimal row tile: tile D as well and
        # accumulate partial row sums across the trailing "arbitrary" grid axis.
        tb = min_tb
        td = _round_down(vmem_budget // (tb * per_elem), _LANE)
        td = max(_LANE, min(td, D))
        return tb, td

    td = D
    tb = vmem_budget // (D * per_elem)

    # Big problems: keep >= 4 grid steps so the BlockSpec pipeline overlaps DMA
    # with compute and (v7x) both TensorCores get work; cdiv(B, 4)-row tiles
    # also keep each per-input DMA block >= ~1 MiB in this regime.
    if 2 * B * D * itemsize > (8 << 20):
        tb = min(tb, max(min_tb, _round_up(_ceil_div(B, 4), _LANE)))

    if tb >= B:
        return B, td

    tb = min(B, max(min_tb, _round_down(tb, _LANE)))
    if tb >= B:
        return B, td

    # Prefer an even number of batch tiles (clean split across v7x's two TCs).
    nb = _ceil_div(B, tb)
    if nb > 2 and nb % 2 == 1:
        tb_even = _round_up(_ceil_div(B, nb + 1), _LANE)
        if 0 < tb_even <= tb and _ceil_div(B, tb_even) % 2 == 0:
            tb = tb_even
    return tb, td


# ----------------------------------------------------------------------------
# Stage 1: per-row sum of squared differences over a (tb, td) tile, emitted as
# a lane-dense (1, tb) slab (accumulated across feature tiles when nd > 1).
# ----------------------------------------------------------------------------
def _row_mse_kernel(yp_ref, yt_ref, loss_ref, *, inv_d, d_total, td, nd):
    # Upcast inside the kernel: narrow dtypes (bf16) stay narrow in HBM / DMA.
    # TODO(synk): if a v7x bundle dump shows VALU saturation for bf16 inputs,
    # compute the difference in bf16 (v6e/v7x VPU is bf16-capable) and upcast
    # once before squaring.
    d = yp_ref[...].astype(jnp.float32) - yt_ref[...].astype(jnp.float32)
    sq = d * d

    if nd > 1 and (d_total % td) != 0:
        # Mask padded feature columns of the last (partial) feature tile so the
        # accumulated row sums stay exact.
        col = (lax.broadcasted_iota(jnp.int32, sq.shape, 1)
               + pl.program_id(1) * td)
        sq = jnp.where(col < d_total, sq, 0.0)

    # Row-sum on the (otherwise idle) MXU: ones(8, td) . sq(tb, td)^T -> (8, tb)
    # with identical rows.  This lands the per-row sums lane-major directly, so
    # the (1, tb) output store is a full-lane, unmasked store and no
    # sublane->lane relayout is needed on the VPU/XLU.
    ones = jnp.ones((8, sq.shape[1]), jnp.float32)
    sums8 = lax.dot_general(
        ones, sq, (((1,), (1,)), ((), ())),
        preferred_element_type=jnp.float32,
        precision=lax.Precision.HIGHEST)          # exact f32 accumulation
    partial = sums8[0:1, :] * inv_d               # (1, tb), lane-dense

    if nd == 1:
        loss_ref[...] = partial
    else:
        j = pl.program_id(1)

        @pl.when(j == 0)
        def _():
            loss_ref[...] = partial

        @pl.when(j > 0)
        def _():
            loss_ref[...] += partial


# ----------------------------------------------------------------------------
# Stage 2: min/max normalization + final reduction on the (1, B) loss slab.
# ----------------------------------------------------------------------------
def _finalize_kernel(loss_ref, out_ref, *, reduction, inv_b):
    loss = loss_ref[...]                      # (1, B), lane-dense f32
    lmin = jnp.min(loss)
    lmax = jnp.max(loss)
    # One scalar divide, then a single vector multiply over the B-vector.
    inv_range = 1.0 / (lmax - lmin)           # NaN/Inf if max == min (matches ref)
    norm = (loss - lmin) * inv_range - 1.0    # == -(1 - (loss-min)/(max-min))
    if reduction == "mean":
        out_ref[0, 0] = jnp.sum(norm) * inv_b
    elif reduction == "sum":
        out_ref[0, 0] = jnp.sum(norm)
    else:  # 'none' -> lane-dense (1, B) slab, squeezed in the wrapper
        out_ref[...] = norm


# ----------------------------------------------------------------------------
# Wrapper.
# ----------------------------------------------------------------------------
def adv_mse_loss_norm(y_pred, y_true, reduction: str = "mean",
                      tb: int | None = None, td: int | None = None):
    """Pallas implementation of AdvMSELossNorm.forward."""
    assert y_pred.shape == y_true.shape and y_pred.ndim == 2
    assert y_pred.dtype == y_true.dtype
    B, D = y_pred.shape
    itemsize = jnp.dtype(y_pred.dtype).itemsize
    row_pack = {1: 32, 2: 16}.get(itemsize, 8)   # packed sublanes per dtype

    vmem_budget, vmem_limit = _vmem_budget_and_limit()
    auto_tb, auto_td = _choose_tiling(B, D, itemsize, vmem_budget)
    tb = auto_tb if tb is None else min(tb, B)
    td = auto_td if td is None else min(td, D)
    if tb < B:
        assert tb % row_pack == 0, "batch tile must respect sublane packing"
    if td < D:
        assert td % _LANE == 0, "feature tile must be a multiple of 128 lanes"
    nb = pl.cdiv(B, tb)
    nd = pl.cdiv(D, td)

    # ---- Stage 1: per-row MSE, pipelined over (batch, feature) tiles ----
    row_loss = pl.pallas_call(
        functools.partial(_row_mse_kernel, inv_d=1.0 / D,
                          d_total=D, td=td, nd=nd),
        grid=(nb, nd),
        in_specs=[
            pl.BlockSpec((tb, td), lambda i, j: (i, j)),
            pl.BlockSpec((tb, td), lambda i, j: (i, j)),
        ],
        # Lane-dense output: the (1, tb) block is resident across the feature
        # ("arbitrary") axis and acts as the row-sum accumulator when nd > 1.
        out_specs=pl.BlockSpec((1, tb), lambda i, j: (0, i)),
        out_shape=jax.ShapeDtypeStruct((1, B), jnp.float32),
        compiler_params=pltpu.CompilerParams(
            dimension_semantics=("parallel", "arbitrary"),
            vmem_limit_bytes=vmem_limit,
        ),
        cost_estimate=pl.CostEstimate(
            flops=5 * B * D,
            transcendentals=0,
            bytes_accessed=2 * B * D * itemsize + 4 * B,
        ),
    )(y_pred, y_true)

    # ---- Stage 2: tiny O(B) normalization + reduction on the (1, B) slab ----
    # TODO(synk): for extremely large B (loss slab > VMEM) this needs a tiled
    # two-pass min/max; irrelevant for any realistic batch size.
    if reduction in ("mean", "sum"):
        out_shape = jax.ShapeDtypeStruct((1, 1), jnp.float32)
        out_spec = pl.BlockSpec((1, 1), lambda: (0, 0))
    else:
        out_shape = jax.ShapeDtypeStruct((1, B), jnp.float32)
        out_spec = pl.BlockSpec((1, B), lambda: (0, 0))

    result = pl.pallas_call(
        functools.partial(_finalize_kernel, reduction=reduction, inv_b=1.0 / B),
        in_specs=[pl.BlockSpec((1, B), lambda: (0, 0))],
        out_specs=out_spec,
        out_shape=out_shape,
        compiler_params=pltpu.CompilerParams(
            vmem_limit_bytes=32 * 1024 * 1024),
        cost_estimate=pl.CostEstimate(
            flops=6 * B, transcendentals=0, bytes_accessed=8 * B + 4),
    )(row_loss)

    if reduction in ("mean", "sum"):
        return result[0, 0]
    return result[0]


# ----------------------------------------------------------------------------
# Pure-JAX reference for correctness checking (f32 math, like the kernel).
# ----------------------------------------------------------------------------
def _reference(y_pred, y_true, reduction="mean"):
    yp = y_pred.astype(jnp.float32)
    yt = y_true.astype(jnp.float32)
    loss = jnp.mean((yp - yt) ** 2, axis=1)
    norm_loss = -(1.0 - (loss - jnp.min(loss)) / (jnp.max(loss) - jnp.min(loss)))
    if reduction == "mean":
        return jnp.mean(norm_loss)
    if reduction == "sum":
        return jnp.sum(norm_loss)
    return norm_loss


if __name__ == "__main__":
    key = jax.random.PRNGKey(0)
    ks = jax.random.split(key, 8)

    # Case 1: 'mean', small single-tile problem (B=24 rows, D=32 features).
    B, D = 24, 32
    yp = jax.random.normal(ks[0], (B, D), dtype=jnp.float32)
    yt = jax.random.normal(ks[1], (B, D), dtype=jnp.float32)
    out = jax.block_until_ready(adv_mse_loss_norm(yp, yt, "mean"))
    ref = _reference(yp, yt, "mean")
    assert jnp.allclose(out, ref, atol=1e-5, rtol=1e-5), (out, ref)

    # Case 2: 'none', batch axis tiled into two full lane-dense 128-row tiles.
    B2, D2 = 256, 64
    yp2 = jax.random.normal(ks[2], (B2, D2), dtype=jnp.float32)
    yt2 = jax.random.normal(ks[3], (B2, D2), dtype=jnp.float32)
    out2 = jax.block_until_ready(adv_mse_loss_norm(yp2, yt2, "none", tb=128))
    ref2 = _reference(yp2, yt2, "none")
    assert out2.shape == (B2,)
    assert jnp.allclose(out2, ref2, atol=1e-5, rtol=1e-5)

    # Case 3: 'sum', bf16 inputs stay narrow in HBM (in-kernel upcast).
    yp3 = yp[:16].astype(jnp.bfloat16)
    yt3 = yt[:16].astype(jnp.bfloat16)
    out3 = jax.block_until_ready(adv_mse_loss_norm(yp3, yt3, "sum"))
    ref3 = _reference(yp3, yt3, "sum")
    assert jnp.allclose(out3, ref3, atol=1e-4, rtol=1e-4), (out3, ref3)

    # Case 4: 'mean', feature axis tiled (td=128 -> 2 accumulation steps).
    B4, D4 = 16, 256
    yp4 = jax.random.normal(ks[4], (B4, D4), dtype=jnp.float32)
    yt4 = jax.random.normal(ks[5], (B4, D4), dtype=jnp.float32)
    out4 = jax.block_until_ready(adv_mse_loss_norm(yp4, yt4, "mean", td=128))
    ref4 = _reference(yp4, yt4, "mean")
    assert jnp.allclose(out4, ref4, atol=1e-5, rtol=1e-5), (out4, ref4)

    # Case 5: 'none', partial last batch tile (B=200, tb=128 -> masked edge).
    B5, D5 = 200, 32
    yp5 = jax.random.normal(ks[6], (B5, D5), dtype=jnp.float32)
    yt5 = jax.random.normal(ks[7], (B5, D5), dtype=jnp.float32)
    out5 = jax.block_until_ready(adv_mse_loss_norm(yp5, yt5, "none", tb=128))
    ref5 = _reference(yp5, yt5, "none")
    assert out5.shape == (B5,)
    assert jnp.allclose(out5, ref5, atol=1e-5, rtol=1e-5)

    print("KERNEL_OK")
</pallas_src>

<mosaic_0001>
module attributes {stable_mosaic.version = 11 : i64} {
  func.func @_row_mse_kernel(%arg0: i32, %arg1: i32, %arg2: memref<24x32xf32, #tpu.memory_space<vmem>>, %arg3: memref<24x32xf32, #tpu.memory_space<vmem>>, %arg4: memref<1x24xf32, #tpu.memory_space<vmem>>) attributes {dimension_semantics = [#tpu.dimension_semantics<parallel>, #tpu.dimension_semantics<arbitrary>], iteration_bounds = array<i64: 1, 1>, scalar_prefetch = 0 : i64, scratch_operands = 0 : i64, tpu.core_type = #tpu.core_type<tc>, window_params = [{transform_indices = @transform_0, window_bounds = array<i64: 24, 32>}, {transform_indices = @transform_1, window_bounds = array<i64: 24, 32>}, {transform_indices = @transform_2, window_bounds = array<i64: 1, 24>}]} {
    %c0 = arith.constant 0 : index
    %c0_0 = arith.constant 0 : index
    %0 = vector.load %arg2[%c0, %c0_0] : memref<24x32xf32, #tpu.memory_space<vmem>>, vector<24x32xf32>
    %c0_1 = arith.constant 0 : index
    %c0_2 = arith.constant 0 : index
    %1 = vector.load %arg3[%c0_1, %c0_2] : memref<24x32xf32, #tpu.memory_space<vmem>>, vector<24x32xf32>
    %2 = arith.subf %0, %1 : vector<24x32xf32>
    %3 = arith.mulf %2, %2 : vector<24x32xf32>
    %cst = arith.constant 1.000000e+00 : f32
    %4 = vector.broadcast %cst : f32 to vector<8x32xf32>
    %cst_3 = arith.constant dense<0.000000e+00> : vector<8x24xf32>
    %5 = tpu.matmul %4, %3, %cst_3 {dimension_numbers = #tpu.dot_dimension_numbers<[1], [1], [0], [0], [0, 0, 1, 0], [], []>, precision = #tpu.contract_precision<fp32>} : vector<8x32xf32>, vector<24x32xf32>, vector<8x24xf32> -> vector<8x24xf32>
    %6 = vector.extract_strided_slice %5 {offsets = [0, 0], sizes = [1, 24], strides = [1, 1]} : vector<8x24xf32> to vector<1x24xf32>
    %cst_4 = arith.constant 3.125000e-02 : f32
    %7 = vector.broadcast %cst_4 : f32 to vector<1x24xf32>
    %8 = arith.mulf %6, %7 : vector<1x24xf32>
    %c0_5 = arith.constant 0 : index
    %c0_6 = arith.constant 0 : index
    %9 = vector.load %arg4[%c0_5, %c0_6] : memref<1x24xf32, #tpu.memory_space<vmem>>, vector<1x24xf32>
    tpu.vector_store %arg4[%c0_5, %c0_6], %8 {strides = array<i32>} : memref<1x24xf32, #tpu.memory_space<vmem>>, vector<1x24xf32>,
    return
  }
  func.func @transform_0(%arg0: i32, %arg1: i32) -> (i32, i32) {
    %c0_i32 = arith.constant 0 : i32
    return %arg0, %arg1 : i32, i32
  }
  func.func @transform_1(%arg0: i32, %arg1: i32) -> (i32, i32) {
    %c0_i32 = arith.constant 0 : i32
    return %arg0, %arg1 : i32, i32
  }
  func.func @transform_2(%arg0: i32, %arg1: i32) -> (i32, i32) {
    %c0_i32 = arith.constant 0 : i32
    %c0_i32_0 = arith.constant 0 : i32
    return %c0_i32, %arg0 : i32, i32
  }
}

</mosaic_0001>

<bundles_post_ra>
// kernel: tpu_custom_call.1
= control target key start
LH: loop header
LB: loop body
LE: loop exit
PB: predicated region body
PF: predicated region fallthrough
CT: control target
= control target key end

     0   :  { %7 = vsyncpa [#allocation3], 0  ;;  %s388_s0 = inlined_call_operand.hbm [shape: f32[24,32], index: 0, kind: input, shape index: {}]   ;;  %s389_s1 = inlined_call_operand.hbm [shape: f32[24,32], index: 1, kind: input, shape index: {}]   ;;  %s390_s2 = inlined_call_operand.hbm [shape: f32[1,24], index: 2, kind: output, shape index: {}]  }
   0x1   :  { %8 = vsyncpa [#allocation6], 0 }
   0x2   :  { %9 = vsyncpa [#allocation4], 0  ;;  %s14_s11 = sshll.u32 %s388_s0, 4  ;;  %s350_s12 = smov [#allocation2]   ;;  %s15_s11 = int_to_ptr.hbm [resolvable:$true] %s14_s11 }
   0x3   :  { %s16_s13 = sshll.u32 %s350_s12, 4  ;;  %s27_s16 = sshll.u32 %s389_s1, 4  ;;  %s17_s13 = int_to_ptr.vmem [resolvable:$true] %s16_s13  ;;  %s28_s16 = int_to_ptr.hbm [resolvable:$true] %s27_s16 }
   0x4   :  { %s351_s17 = smov 128   ;;  %s352_s18 = smov 8  }
   0x5   :  { %22 = dma.hbm_to_vmem [thread:$0]  %s15_s11, 384, %s17_s13, [#allocation3], %s351_s17, %s351_s17, %s352_s18  }
   0x6   :  { %s353_s19 = smov [#allocation5]  }
   0x7   :  { %s29_s20 = sshll.u32 %s353_s19, 4  ;;  %s30_s20 = int_to_ptr.vmem [resolvable:$true] %s29_s20 }
   0x8   :  { %35 = dma.hbm_to_vmem [thread:$0]  %s28_s16, 384, %s30_s20, [#allocation6], %s351_s17, %s351_s17, %s352_s18  }
   0x9   :  { %344 = dma.done.wait [#allocation3], 384  }
   0xa   :  { %345 = vsyncadd [#allocation3], 4294966912 }
   0xb   :  { %346 = dma.done.wait [#allocation6], 384  }
   0xc   :  { %347 = vsyncadd [#allocation6], 4294966912  ;;  %vm56_vm0 = vcmask 261120   ;;  %v46_v0 = vld [vmem:[#allocation2 + $0x10] sm:$0xff]  ;;  %v49_v1 = vld [vmem:[#allocation5 + $0x10] sm:$0xff]  ;;  %v354_v3 = vmov 0  }
   0xd   :  { %v45_v2 = vld [vmem:[#allocation2 + $0x8] sm:$0xff]  ;;  %v58_v4 = vsel %vm56_vm0, 1.0, %v354_v3  ;;  %v52_v5 = vsub.f32 %v46_v0, %v49_v1  ;;  %v48_v6 = vld [vmem:[#allocation5 + $0x8] sm:$0xff]  ;;  %v47_v8 = vld [vmem:[#allocation5] sm:$0xff]  ;;  %v355_v36 = vmov 1.0   ;;  %s356_s0 = smov [#allocation7]  }
   0xe   :  { %v44_v7 = vld [vmem:[#allocation2] sm:$0xff]  ;;  %v51_v9 = vsub.f32 %v45_v2, %v48_v6  ;;  %v89_v12 = vsub.f32 %v58_v4, %v58_v4  ;;  %s249_s1 = sshll.u32 %s356_s0, 4  ;;  %s251_s23 = sshll.u32 %s390_s2, 4  ;;  %vm242_vm1 = vcmask 188416   ;;  %s250_s1 = int_to_ptr.vmem [resolvable:$true] %s249_s1  ;;  %s252_s23 = int_to_ptr.hbm [resolvable:$true] %s251_s23 }
   0xf   :  { %v50_v10 = vsub.f32 %v44_v7, %v47_v8  ;;  %v55_v11 = vmul.f32 %v52_v5, %v52_v5 }
  0x10   :  { %v54_v13 = vmul.f32 %v51_v9, %v51_v9  ;;  %v90_v21 = vand.u32 4294901760, %v89_v12 }
  0x11   :  { %v53_v14 = vmul.f32 %v50_v10, %v50_v10  ;;  %v67_v15 = vsel %vm56_vm0, %v55_v11, 0 }
  0x12   :  { %v82_v16 = vand.u32 4294901760, %v67_v15  ;;  %v64_v17 = vsel %vm56_vm0, %v54_v13, 0  ;;  %v91_v27 = vsub.f32 %v89_v12, %v90_v21 }
  0x13   :  { %v61_v18 = vsel %vm56_vm0, %v53_v14, 0  ;;  %v84_v19 = vand.u32 4294901760, %v64_v17 }
  0x14   :  { %v86_v20 = vand.u32 4294901760, %v61_v18  ;;  %v111_v22 = vsub.f32 %v67_v15, %v82_v16  ;;  %83 = vmatpush.xpose.msra.mxu0 %v82_v16  ;;  %175 = vmatpush.xpose.msra.mxu3 %v82_v16  ;;  %v92_v32 = vand.u32 4294901760, %v91_v27 }
  0x15   :  { %v117_v23 = vsub.f32 %v64_v17, %v84_v19 }
  0x16   :  { %v123_v24 = vsub.f32 %v61_v18, %v86_v20  ;;  %148 = vmatpush.xpose.msra.mxu2 %v111_v22  ;;  %v112_v25 = vand.u32 4294901760, %v111_v22 }
  0x17   :  { %v118_v26 = vand.u32 4294901760, %v117_v23 }
  0x18   :  { %v113_v28 = vsub.f32 %v111_v22, %v112_v25  ;;  %85 = vmatpush.xpose.msra.mxu0 %v84_v19  ;;  %177 = vmatpush.xpose.msra.mxu3 %v84_v19  ;;  %v124_v29 = vand.u32 4294901760, %v123_v24 }
  0x19   :  { %v119_v30 = vsub.f32 %v117_v23, %v118_v26 }
  0x1a   :  { %v114_v31 = vand.u32 4294901760, %v113_v28  ;;  %151 = vmatpush.xpose.msra.mxu2 %v117_v23  ;;  %v125_v34 = vsub.f32 %v123_v24, %v124_v29 }
  0x1b   :  { %v120_v33 = vand.u32 4294901760, %v119_v30 }
  0x1c   :  { %115 = vmatpush.xpose.msra.mxu1 %v114_v31  ;;  %87 = vmatpush.xpose.msra.mxu0 %v86_v20  ;;  %v126_v35 = vand.u32 4294901760, %v125_v34 }
  0x1d   :  { %179 = vmatpush.xpose.msra.mxu3 %v86_v20 }
  0x1e   :  { %154 = vmatpush.xpose.msra.mxu2 %v123_v24 }
  0x1f   :  { %93 = vmatmul.f32.vlgmr.msra.gmra.mxu0 %v92_v32 }
  0x20   :  { %203 = vmatpush.xpose.msrb.mxu0 %v112_v25  ;;  %121 = vmatpush.xpose.msra.mxu1 %v120_v33 }
  0x21   :  { %183 = vmatmul.f32.vlgmr.msra.gmra.mxu3 %v90_v21  ;;  %157 = vmatmul.f32.vlgmr.msra.gmra.mxu2 %v89_v12 }
  0x24   :  { %207 = vmatpush.xpose.msrb.mxu0 %v118_v26  ;;  %127 = vmatpush.xpose.msra.mxu1 %v126_v35 }
  0x27   :  { %262 = vmatmul.msk.f32.vlgmr.msra.gmra.mxu1 %vm56_vm0, %v355_v36 }
  0x28   :  { %231 = vmatpush.xpose.msrb.mxu1 %v82_v16  ;;  %211 = vmatpush.xpose.msrb.mxu0 %v124_v29 }
  0x2b   :  { %263 = vmatmul.msk.f32.vlgmr.msrb.gmra.mxu0 %vm56_vm0, %v355_v36 }
  0x2c   :  { %233 = vmatpush.xpose.msrb.mxu1 %v84_v19 }
  0x30   :  { %235 = vmatpush.xpose.msrb.mxu1 %v86_v20 }
  0x33   :  { %264 = vmatmul.msk.f32.vlgmr.msrb.gmra.mxu1 %vm56_vm0, %v355_v36 }
  0x9c   :  { %v94_v37 = vpop.f32.mrf.mxu0 }
  0xa4   :  { %v130_v38 = vpop.f32.mrf.mxu1  ;;  %v158_v39 = vpop.f32.mrf.mxu2 }
  0xa5   :  { %v131_v40 = vadd.f32 %v130_v38, %v94_v37  ;;  %v184_v41 = vpop.f32.mrf.mxu3 }
  0xa7   :  { %v159_v42 = vadd.f32 %v158_v39, %v131_v40 }
  0xa8   :  { %v214_v43 = vpop.f32.mrf.mxu0 }
  0xa9   :  { %v185_v44 = vadd.f32 %v184_v41, %v159_v42 }
  0xab   :  { %v215_v45 = vadd.f32 %v214_v43, %v185_v44 }
  0xb0   :  { %v238_v46 = vpop.f32.mrf.mxu1 }
  0xb1   :  { %v239_v47 = vadd.f32 %v238_v46, %v215_v45 }
  0xb3   :  { %v241_v48 = vmul.f32 0.03125, %v239_v47 }
  0xb5   :  { %243 = vst.msk [vmem:[#allocation7] sm:$0x1] %vm242_vm1, %v241_v48 }
  0xb6   :  { %254 = dma.vmem_to_hbm [thread:$0]  %s250_s1, 16, %s252_s23, [#allocation4]  }
  0xb7   :  { %348 = dma.done.wait [#allocation4], 16  }
  0xb8   :  { %349 = vsyncadd [#allocation4], 4294967280 }
  0xb9   :  { %259 = vsyncpa [#allocation3], 1 }
  0xba   :  { %260 = vsyncpa [#allocation6], 1 }
  0xbb   :  { %261 = vsyncpa [#allocation4], 1 }

</bundles_post_ra>
